<compile_context>
chip_gen: v6e
topology: v6e:2x2x1
jax: 0.10.0
libtpu: 0.0.40
codegen_flags: <defaults>
</compile_context>

<pallas_src>
import jax
import jax.numpy as jnp
from jax.experimental import pallas as pl
from jax.experimental.pallas import tpu as pltpu


def _token_encoder_kernel(tok_ref, w1_ref, b1_ref, w2_ref, b2_ref, w3_ref, b3_ref,
                          gamma_ref, beta_ref, o_ref):
    # Linear 1 (token_dim -> 64) + ReLU.  Feed native dtype into the MXU, accumulate in f32.
    h = jnp.dot(tok_ref[...], w1_ref[...], preferred_element_type=jnp.float32)
    h = h + b1_ref[...].astype(jnp.float32)
    h = jnp.maximum(h, 0.0)

    # Linear 2 (64 -> 128) + ReLU.
    h = jnp.dot(h.astype(w2_ref.dtype), w2_ref[...], preferred_element_type=jnp.float32)
    h = h + b2_ref[...].astype(jnp.float32)
    h = jnp.maximum(h, 0.0)

    # Linear 3 (128 -> projection_dim).
    h = jnp.dot(h.astype(w3_ref.dtype), w3_ref[...], preferred_element_type=jnp.float32)
    h = h + b3_ref[...].astype(jnp.float32)

    # LayerNorm over the feature dim (eps=1e-5, biased variance, matches nn.LayerNorm).
    mean = jnp.mean(h, axis=-1, keepdims=True)
    hc = h - mean                                   # centered once, reused twice
    var = jnp.mean(hc * hc, axis=-1, keepdims=True)
    inv = jax.lax.rsqrt(var + jnp.float32(1e-5))
    out = hc * inv * gamma_ref[...].astype(jnp.float32) + beta_ref[...].astype(jnp.float32)

    o_ref[...] = out.astype(o_ref.dtype)


def _pick_block_m(token_size, target=256):
    """One grid step for small token counts; MXU-aligned (multiple-of-8, <=256) tiles otherwise."""
    if token_size <= target:
        return token_size
    for bm in range(target, 7, -8):
        if token_size % bm == 0:
            return bm
    return token_size  # no nice divisor: fall back to a single step


def _build_call(token_size, token_dim, hid1, hid2, proj_dim, out_dtype, block_m,
                single_buffer_params):
    def const_spec(shape):
        # Grid-invariant operands: block index never changes, so one VMEM buffer is enough.
        if single_buffer_params:
            return pl.BlockSpec(shape, lambda i: (0, 0), pipeline_mode=pl.Buffered(1))
        return pl.BlockSpec(shape, lambda i: (0, 0))

    grid = (token_size // block_m,)
    return pl.pallas_call(
        _token_encoder_kernel,
        out_shape=jax.ShapeDtypeStruct((token_size, proj_dim), out_dtype),
        grid_spec=pltpu.PrefetchScalarGridSpec(
            num_scalar_prefetch=0,
            grid=grid,
            in_specs=[
                pl.BlockSpec((block_m, token_dim), lambda i: (i, 0)),  # radio_token tile
                const_spec((token_dim, hid1)),                         # W1
                const_spec((1, hid1)),                                 # b1
                const_spec((hid1, hid2)),                              # W2
                const_spec((1, hid2)),                                 # b2
                const_spec((hid2, proj_dim)),                          # W3
                const_spec((1, proj_dim)),                             # b3
                const_spec((1, proj_dim)),                             # LayerNorm gamma
                const_spec((1, proj_dim)),                             # LayerNorm beta
            ],
            out_specs=pl.BlockSpec((block_m, proj_dim), lambda i: (i, 0)),
        ),
        compiler_params=pltpu.CompilerParams(
            dimension_semantics=("parallel",),
            vmem_limit_bytes=32 * 1024 * 1024,   # above v5e's 16 MiB scoped default
        ),
    )


def modality_token_encoder(tokens, w1, b1, w2, b2, w3, b3, gamma, beta, *, block_m=None):
    """tokens: [token_size, token_dim]; w*: [in, out]; b*/gamma/beta: [1, out]."""
    token_size, token_dim = tokens.shape
    hid1 = w1.shape[1]
    hid2 = w2.shape[1]
    proj_dim = w3.shape[1]
    if block_m is None:
        block_m = _pick_block_m(token_size)
    assert token_size % block_m == 0, "token_size must be divisible by block_m"

    args = (tokens, w1, b1, w2, b2, w3, b3, gamma, beta)
    try:
        call = _build_call(token_size, token_dim, hid1, hid2, proj_dim, tokens.dtype,
                           block_m, single_buffer_params=True)
        return call(*args)
    except Exception:
        # Fallback if this runtime rejects pipeline_mode=pl.Buffered(1) on constant specs.
        call = _build_call(token_size, token_dim, hid1, hid2, proj_dim, tokens.dtype,
                           block_m, single_buffer_params=False)
        return call(*args)


def _reference(tokens, w1, b1, w2, b2, w3, b3, gamma, beta):
    h = jnp.maximum(tokens @ w1 + b1, 0.0)
    h = jnp.maximum(h @ w2 + b2, 0.0)
    h = h @ w3 + b3
    mean = jnp.mean(h, axis=-1, keepdims=True)
    var = jnp.mean((h - mean) ** 2, axis=-1, keepdims=True)
    return (h - mean) / jnp.sqrt(var + 1e-5) * gamma + beta


if __name__ == "__main__":
    # Small shapes consistent with the module: hidden dims 64 and 128 are fixed by the
    # nn.Sequential; pick token_size=16, token_dim=32, projection_dim=128 for the demo.
    TOKEN_SIZE, TOKEN_DIM, HID1, HID2, PROJ_DIM = 16, 32, 64, 128, 128

    key = jax.random.PRNGKey(0)
    kstd, ktok, kw1, kb1, kw2, kb2, kw3, kb3 = jax.random.split(key, 8)

    # radio_token ~ Normal(0, std) with std ~ U[0.1, 0.6)  (deterministic here).
    std = jax.random.uniform(kstd, ()) * 0.5 + 0.1
    tokens = jax.random.normal(ktok, (TOKEN_SIZE, TOKEN_DIM), dtype=jnp.float32) * std

    # PyTorch Linear stores [out, in]; we keep [in, out] so the kernel does x @ W + b.
    lim1 = 1.0 / (TOKEN_DIM ** 0.5)
    w1 = jax.random.uniform(kw1, (TOKEN_DIM, HID1), jnp.float32, -lim1, lim1)
    b1 = jax.random.uniform(kb1, (1, HID1), jnp.float32, -lim1, lim1)
    lim2 = 1.0 / (HID1 ** 0.5)
    w2 = jax.random.uniform(kw2, (HID1, HID2), jnp.float32, -lim2, lim2)
    b2 = jax.random.uniform(kb2, (1, HID2), jnp.float32, -lim2, lim2)
    lim3 = 1.0 / (HID2 ** 0.5)
    w3 = jax.random.uniform(kw3, (HID2, PROJ_DIM), jnp.float32, -lim3, lim3)
    b3 = jax.random.uniform(kb3, (1, PROJ_DIM), jnp.float32, -lim3, lim3)
    gamma = jnp.ones((1, PROJ_DIM), jnp.float32)   # nn.LayerNorm default weight
    beta = jnp.zeros((1, PROJ_DIM), jnp.float32)   # nn.LayerNorm default bias

    out = modality_token_encoder(tokens, w1, b1, w2, b2, w3, b3, gamma, beta)
    out = jax.block_until_ready(out)

    ref = _reference(tokens, w1, b1, w2, b2, w3, b3, gamma, beta)
    assert out.shape == (TOKEN_SIZE, PROJ_DIM)
    assert jnp.allclose(out, ref, atol=1e-4, rtol=1e-4), "mismatch vs JAX reference"

    print("KERNEL_OK")
</pallas_src>

<mosaic_0001>
module attributes {stable_mosaic.version = 11 : i64} {
  func.func @_token_encoder_kernel(%arg0: i32, %arg1: memref<16x32xf32, #tpu.memory_space<vmem>>, %arg2: memref<32x64xf32, #tpu.memory_space<vmem>>, %arg3: memref<1x64xf32, #tpu.memory_space<vmem>>, %arg4: memref<64x128xf32, #tpu.memory_space<vmem>>, %arg5: memref<1x128xf32, #tpu.memory_space<vmem>>, %arg6: memref<128x128xf32, #tpu.memory_space<vmem>>, %arg7: memref<1x128xf32, #tpu.memory_space<vmem>>, %arg8: memref<1x128xf32, #tpu.memory_space<vmem>>, %arg9: memref<1x128xf32, #tpu.memory_space<vmem>>, %arg10: memref<16x128xf32, #tpu.memory_space<vmem>>) attributes {dimension_semantics = [#tpu.dimension_semantics<parallel>], iteration_bounds = array<i64: 1>, scalar_prefetch = 0 : i64, scratch_operands = 0 : i64, tpu.core_type = #tpu.core_type<tc>, window_params = [{transform_indices = @transform_0, window_bounds = array<i64: 16, 32>}, {pipeline_mode = #tpu.pipeline_mode<synchronous>, transform_indices = @transform_1, window_bounds = array<i64: 32, 64>}, {pipeline_mode = #tpu.pipeline_mode<synchronous>, transform_indices = @transform_2, window_bounds = array<i64: 1, 64>}, {pipeline_mode = #tpu.pipeline_mode<synchronous>, transform_indices = @transform_3, window_bounds = array<i64: 64, 128>}, {pipeline_mode = #tpu.pipeline_mode<synchronous>, transform_indices = @transform_4, window_bounds = array<i64: 1, 128>}, {pipeline_mode = #tpu.pipeline_mode<synchronous>, transform_indices = @transform_5, window_bounds = array<i64: 128, 128>}, {pipeline_mode = #tpu.pipeline_mode<synchronous>, transform_indices = @transform_6, window_bounds = array<i64: 1, 128>}, {pipeline_mode = #tpu.pipeline_mode<synchronous>, transform_indices = @transform_7, window_bounds = array<i64: 1, 128>}, {pipeline_mode = #tpu.pipeline_mode<synchronous>, transform_indices = @transform_8, window_bounds = array<i64: 1, 128>}, {transform_indices = @transform_9, window_bounds = array<i64: 16, 128>}]} {
    %c0 = arith.constant 0 : index
    %c0_0 = arith.constant 0 : index
    %0 = vector.load %arg1[%c0, %c0_0] : memref<16x32xf32, #tpu.memory_space<vmem>>, vector<16x32xf32>
    %c0_1 = arith.constant 0 : index
    %c0_2 = arith.constant 0 : index
    %1 = vector.load %arg2[%c0_1, %c0_2] : memref<32x64xf32, #tpu.memory_space<vmem>>, vector<32x64xf32>
    %cst = arith.constant dense<0.000000e+00> : vector<16x64xf32>
    %2 = tpu.matmul %0, %1, %cst {dimension_numbers = #tpu.dot_dimension_numbers<[1], [0], [0], [1], [0, 0, 1, 1], [], []>} : vector<16x32xf32>, vector<32x64xf32>, vector<16x64xf32> -> vector<16x64xf32>
    %c0_3 = arith.constant 0 : index
    %c0_4 = arith.constant 0 : index
    %3 = vector.load %arg3[%c0_3, %c0_4] : memref<1x64xf32, #tpu.memory_space<vmem>>, vector<1x64xf32>
    %4 = vector.broadcast %3 : vector<1x64xf32> to vector<16x64xf32>
    %5 = arith.addf %2, %4 : vector<16x64xf32>
    %cst_5 = arith.constant 0.000000e+00 : f32
    %6 = vector.broadcast %cst_5 : f32 to vector<16x64xf32>
    %7 = arith.maximumf %5, %6 : vector<16x64xf32>
    %c0_6 = arith.constant 0 : index
    %c0_7 = arith.constant 0 : index
    %8 = vector.load %arg4[%c0_6, %c0_7] : memref<64x128xf32, #tpu.memory_space<vmem>>, vector<64x128xf32>
    %cst_8 = arith.constant dense<0.000000e+00> : vector<16x128xf32>
    %9 = tpu.matmul %7, %8, %cst_8 {dimension_numbers = #tpu.dot_dimension_numbers<[1], [0], [0], [1], [0, 0, 1, 1], [], []>} : vector<16x64xf32>, vector<64x128xf32>, vector<16x128xf32> -> vector<16x128xf32>
    %c0_9 = arith.constant 0 : index
    %c0_10 = arith.constant 0 : index
    %10 = vector.load %arg5[%c0_9, %c0_10] : memref<1x128xf32, #tpu.memory_space<vmem>>, vector<1x128xf32>
    %11 = vector.broadcast %10 : vector<1x128xf32> to vector<16x128xf32>
    %12 = arith.addf %9, %11 : vector<16x128xf32>
    %cst_11 = arith.constant 0.000000e+00 : f32
    %13 = vector.broadcast %cst_11 : f32 to vector<16x128xf32>
    %14 = arith.maximumf %12, %13 : vector<16x128xf32>
    %c0_12 = arith.constant 0 : index
    %c0_13 = arith.constant 0 : index
    %15 = vector.load %arg6[%c0_12, %c0_13] : memref<128x128xf32, #tpu.memory_space<vmem>>, vector<128x128xf32>
    %cst_14 = arith.constant dense<0.000000e+00> : vector<16x128xf32>
    %16 = tpu.matmul %14, %15, %cst_14 {dimension_numbers = #tpu.dot_dimension_numbers<[1], [0], [0], [1], [0, 0, 1, 1], [], []>} : vector<16x128xf32>, vector<128x128xf32>, vector<16x128xf32> -> vector<16x128xf32>
    %c0_15 = arith.constant 0 : index
    %c0_16 = arith.constant 0 : index
    %17 = vector.load %arg7[%c0_15, %c0_16] : memref<1x128xf32, #tpu.memory_space<vmem>>, vector<1x128xf32>
    %18 = vector.broadcast %17 : vector<1x128xf32> to vector<16x128xf32>
    %19 = arith.addf %16, %18 : vector<16x128xf32>
    %cst_17 = arith.constant dense<0.000000e+00> : vector<16xf32>
    %20 = vector.multi_reduction <add>, %19, %cst_17 [1] : vector<16x128xf32> to vector<16xf32>
    %21 = vector.shape_cast %20 : vector<16xf32> to vector<16x1xf32>
    %cst_18 = arith.constant 1.280000e+02 : f32
    %22 = vector.broadcast %cst_18 : f32 to vector<16x1xf32>
    %23 = arith.divf %21, %22 : vector<16x1xf32>
    %24 = vector.broadcast %23 : vector<16x1xf32> to vector<16x128xf32>
    %25 = arith.subf %19, %24 : vector<16x128xf32>
    %26 = arith.mulf %25, %25 : vector<16x128xf32>
    %cst_19 = arith.constant dense<0.000000e+00> : vector<16xf32>
    %27 = vector.multi_reduction <add>, %26, %cst_19 [1] : vector<16x128xf32> to vector<16xf32>
    %28 = vector.shape_cast %27 : vector<16xf32> to vector<16x1xf32>
    %cst_20 = arith.constant 1.280000e+02 : f32
    %29 = vector.broadcast %cst_20 : f32 to vector<16x1xf32>
    %30 = arith.divf %28, %29 : vector<16x1xf32>
    %cst_21 = arith.constant 9.99999974E-6 : f32
    %31 = vector.broadcast %cst_21 : f32 to vector<16x1xf32>
    %32 = arith.addf %30, %31 : vector<16x1xf32>
    %33 = math.rsqrt %32 : vector<16x1xf32>
    %34 = vector.broadcast %33 : vector<16x1xf32> to vector<16x128xf32>
    %35 = arith.mulf %25, %34 : vector<16x128xf32>
    %c0_22 = arith.constant 0 : index
    %c0_23 = arith.constant 0 : index
    %36 = vector.load %arg8[%c0_22, %c0_23] : memref<1x128xf32, #tpu.memory_space<vmem>>, vector<1x128xf32>
    %37 = vector.broadcast %36 : vector<1x128xf32> to vector<16x128xf32>
    %38 = arith.mulf %35, %37 : vector<16x128xf32>
    %c0_24 = arith.constant 0 : index
    %c0_25 = arith.constant 0 : index
    %39 = vector.load %arg9[%c0_24, %c0_25] : memref<1x128xf32, #tpu.memory_space<vmem>>, vector<1x128xf32>
    %40 = vector.broadcast %39 : vector<1x128xf32> to vector<16x128xf32>
    %41 = arith.addf %38, %40 : vector<16x128xf32>
    %c0_26 = arith.constant 0 : index
    %c0_27 = arith.constant 0 : index
    %42 = vector.load %arg10[%c0_26, %c0_27] : memref<16x128xf32, #tpu.memory_space<vmem>>, vector<16x128xf32>
    tpu.vector_store %arg10[%c0_26, %c0_27], %41 {strides = array<i32>} : memref<16x128xf32, #tpu.memory_space<vmem>>, vector<16x128xf32>,
    return
  }
  func.func @transform_0(%arg0: i32) -> (i32, i32) {
    %c0_i32 = arith.constant 0 : i32
    %c0_i32_0 = arith.constant 0 : i32
    return %arg0, %c0_i32 : i32, i32
  }
  func.func @transform_1(%arg0: i32) -> (i32, i32) {
    %c0_i32 = arith.constant 0 : i32
    %c0_i32_0 = arith.constant 0 : i32
    %c0_i32_1 = arith.constant 0 : i32
    return %c0_i32, %c0_i32_0 : i32, i32
  }
  func.func @transform_2(%arg0: i32) -> (i32, i32) {
    %c0_i32 = arith.constant 0 : i32
    %c0_i32_0 = arith.constant 0 : i32
    %c0_i32_1 = arith.constant 0 : i32
    return %c0_i32, %c0_i32_0 : i32, i32
  }
  func.func @transform_3(%arg0: i32) -> (i32, i32) {
    %c0_i32 = arith.constant 0 : i32
    %c0_i32_0 = arith.constant 0 : i32
    %c0_i32_1 = arith.constant 0 : i32
    return %c0_i32, %c0_i32_0 : i32, i32
  }
  func.func @transform_4(%arg0: i32) -> (i32, i32) {
    %c0_i32 = arith.constant 0 : i32
    %c0_i32_0 = arith.constant 0 : i32
    %c0_i32_1 = arith.constant 0 : i32
    return %c0_i32, %c0_i32_0 : i32, i32
  }
  func.func @transform_5(%arg0: i32) -> (i32, i32) {
    %c0_i32 = arith.constant 0 : i32
    %c0_i32_0 = arith.constant 0 : i32
    %c0_i32_1 = arith.constant 0 : i32
    return %c0_i32, %c0_i32_0 : i32, i32
  }
  func.func @transform_6(%arg0: i32) -> (i32, i32) {
    %c0_i32 = arith.constant 0 : i32
    %c0_i32_0 = arith.constant 0 : i32
    %c0_i32_1 = arith.constant 0 : i32
    return %c0_i32, %c0_i32_0 : i32, i32
  }
  func.func @transform_7(%arg0: i32) -> (i32, i32) {
    %c0_i32 = arith.constant 0 : i32
    %c0_i32_0 = arith.constant 0 : i32
    %c0_i32_1 = arith.constant 0 : i32
    return %c0_i32, %c0_i32_0 : i32, i32
  }
  func.func @transform_8(%arg0: i32) -> (i32, i32) {
    %c0_i32 = arith.constant 0 : i32
    %c0_i32_0 = arith.constant 0 : i32
    %c0_i32_1 = arith.constant 0 : i32
    return %c0_i32, %c0_i32_0 : i32, i32
  }
  func.func @transform_9(%arg0: i32) -> (i32, i32) {
    %c0_i32 = arith.constant 0 : i32
    %c0_i32_0 = arith.constant 0 : i32
    return %arg0, %c0_i32 : i32, i32
  }
}

module attributes {stable_mosaic.version = 11 : i64} {
  func.func @_token_encoder_kernel(%arg0: i32, %arg1: memref<16x32xf32, #tpu.memory_space<vmem>>, %arg2: memref<32x64xf32, #tpu.memory_space<vmem>>, %arg3: memref<1x64xf32, #tpu.memory_space<vmem>>, %arg4: memref<64x128xf32, #tpu.memory_space<vmem>>, %arg5: memref<1x128xf32, #tpu.memory_space<vmem>>, %arg6: memref<128x128xf32, #tpu.memory_space<vmem>>, %arg7: memref<1x128xf32, #tpu.memory_space<vmem>>, %arg8: memref<1x128xf32, #tpu.memory_space<vmem>>, %arg9: memref<1x128xf32, #tpu.memory_space<vmem>>, %arg10: memref<16x128xf32, #tpu.memory_space<vmem>>) attributes {dimension_semantics = [#tpu.dimension_semantics<parallel>], iteration_bounds = array<i64: 1>, scalar_prefetch = 0 : i64, scratch_operands = 0 : i64, tpu.core_type = #tpu.core_type<tc>, window_params = [{transform_indices = @transform_0, window_bounds = array<i64: 16, 32>}, {pipeline_mode = #tpu.pipeline_mode<synchronous>, transform_indices = @transform_1, window_bounds = array<i64: 32, 64>}, {pipeline_mode = #tpu.pipeline_mode<synchronous>, transform_indices = @transform_2, window_bounds = array<i64: 1, 64>}, {pipeline_mode = #tpu.pipeline_mode<synchronous>, transform_indices = @transform_3, window_bounds = array<i64: 64, 128>}, {pipeline_mode = #tpu.pipeline_mode<synchronous>, transform_indices = @transform_4, window_bounds = array<i64: 1, 128>}, {pipeline_mode = #tpu.pipeline_mode<synchronous>, transform_indices = @transform_5, window_bounds = array<i64: 128, 128>}, {pipeline_mode = #tpu.pipeline_mode<synchronous>, transform_indices = @transform_6, window_bounds = array<i64: 1, 128>}, {pipeline_mode = #tpu.pipeline_mode<synchronous>, transform_indices = @transform_7, window_bounds = array<i64: 1, 128>}, {pipeline_mode = #tpu.pipeline_mode<synchronous>, transform_indices = @transform_8, window_bounds = array<i64: 1, 128>}, {transform_indices = @transform_9, window_bounds = array<i64: 16, 128>}]} {
    %c0 = arith.constant 0 : index
    %c0_0 = arith.constant 0 : index
    %0 = vector.load %arg1[%c0, %c0_0] : memref<16x32xf32, #tpu.memory_space<vmem>>, vector<16x32xf32>
    %c0_1 = arith.constant 0 : index
    %c0_2 = arith.constant 0 : index
    %1 = vector.load %arg2[%c0_1, %c0_2] : memref<32x64xf32, #tpu.memory_space<vmem>>, vector<32x64xf32>
    %cst = arith.constant dense<0.000000e+00> : vector<16x64xf32>
    %2 = tpu.matmul %0, %1, %cst {dimension_numbers = #tpu.dot_dimension_numbers<[1], [0], [0], [1], [0, 0, 1, 1], [], []>} : vector<16x32xf32>, vector<32x64xf32>, vector<16x64xf32> -> vector<16x64xf32>
    %c0_3 = arith.constant 0 : index
    %c0_4 = arith.constant 0 : index
    %3 = vector.load %arg3[%c0_3, %c0_4] : memref<1x64xf32, #tpu.memory_space<vmem>>, vector<1x64xf32>
    %4 = vector.broadcast %3 : vector<1x64xf32> to vector<16x64xf32>
    %5 = arith.addf %2, %4 : vector<16x64xf32>
    %cst_5 = arith.constant 0.000000e+00 : f32
    %6 = vector.broadcast %cst_5 : f32 to vector<16x64xf32>
    %7 = arith.maximumf %5, %6 : vector<16x64xf32>
    %c0_6 = arith.constant 0 : index
    %c0_7 = arith.constant 0 : index
    %8 = vector.load %arg4[%c0_6, %c0_7] : memref<64x128xf32, #tpu.memory_space<vmem>>, vector<64x128xf32>
    %cst_8 = arith.constant dense<0.000000e+00> : vector<16x128xf32>
    %9 = tpu.matmul %7, %8, %cst_8 {dimension_numbers = #tpu.dot_dimension_numbers<[1], [0], [0], [1], [0, 0, 1, 1], [], []>} : vector<16x64xf32>, vector<64x128xf32>, vector<16x128xf32> -> vector<16x128xf32>
    %c0_9 = arith.constant 0 : index
    %c0_10 = arith.constant 0 : index
    %10 = vector.load %arg5[%c0_9, %c0_10] : memref<1x128xf32, #tpu.memory_space<vmem>>, vector<1x128xf32>
    %11 = vector.broadcast %10 : vector<1x128xf32> to vector<16x128xf32>
    %12 = arith.addf %9, %11 : vector<16x128xf32>
    %cst_11 = arith.constant 0.000000e+00 : f32
    %13 = vector.broadcast %cst_11 : f32 to vector<16x128xf32>
    %14 = arith.maximumf %12, %13 : vector<16x128xf32>
    %c0_12 = arith.constant 0 : index
    %c0_13 = arith.constant 0 : index
    %15 = vector.load %arg6[%c0_12, %c0_13] : memref<128x128xf32, #tpu.memory_space<vmem>>, vector<128x128xf32>
    %cst_14 = arith.constant dense<0.000000e+00> : vector<16x128xf32>
    %16 = tpu.matmul %14, %15, %cst_14 {dimension_numbers = #tpu.dot_dimension_numbers<[1], [0], [0], [1], [0, 0, 1, 1], [], []>} : vector<16x128xf32>, vector<128x128xf32>, vector<16x128xf32> -> vector<16x128xf32>
    %c0_15 = arith.constant 0 : index
    %c0_16 = arith.constant 0 : index
    %17 = vector.load %arg7[%c0_15, %c0_16] : memref<1x128xf32, #tpu.memory_space<vmem>>, vector<1x128xf32>
    %18 = vector.broadcast %17 : vector<1x128xf32> to vector<16x128xf32>
    %19 = arith.addf %16, %18 : vector<16x128xf32>
    %cst_17 = arith.constant dense<0.000000e+00> : vector<16xf32>
    %20 = vector.multi_reduction <add>, %19, %cst_17 [1] : vector<16x128xf32> to vector<16xf32>
    %21 = vector.shape_cast %20 : vector<16xf32> to vector<16x1xf32>
    %cst_18 = arith.constant 1.280000e+02 : f32
    %22 = vector.broadcast %cst_18 : f32 to vector<16x1xf32>
    %23 = arith.divf %21, %22 : vector<16x1xf32>
    %24 = vector.broadcast %23 : vector<16x1xf32> to vector<16x128xf32>
    %25 = arith.subf %19, %24 : vector<16x128xf32>
    %26 = arith.mulf %25, %25 : vector<16x128xf32>
    %cst_19 = arith.constant dense<0.000000e+00> : vector<16xf32>
    %27 = vector.multi_reduction <add>, %26, %cst_19 [1] : vector<16x128xf32> to vector<16xf32>
    %28 = vector.shape_cast %27 : vector<16xf32> to vector<16x1xf32>
    %cst_20 = arith.constant 1.280000e+02 : f32
    %29 = vector.broadcast %cst_20 : f32 to vector<16x1xf32>
    %30 = arith.divf %28, %29 : vector<16x1xf32>
    %cst_21 = arith.constant 9.99999974E-6 : f32
    %31 = vector.broadcast %cst_21 : f32 to vector<16x1xf32>
    %32 = arith.addf %30, %31 : vector<16x1xf32>
    %33 = math.rsqrt %32 : vector<16x1xf32>
    %34 = vector.broadcast %33 : vector<16x1xf32> to vector<16x128xf32>
    %35 = arith.mulf %25, %34 : vector<16x128xf32>
    %c0_22 = arith.constant 0 : index
    %c0_23 = arith.constant 0 : index
    %36 = vector.load %arg8[%c0_22, %c0_23] : memref<1x128xf32, #tpu.memory_space<vmem>>, vector<1x128xf32>
    %37 = vector.broadcast %36 : vector<1x128xf32> to vector<16x128xf32>
    %38 = arith.mulf %35, %37 : vector<16x128xf32>
    %c0_24 = arith.constant 0 : index
    %c0_25 = arith.constant 0 : index
    %39 = vector.load %arg9[%c0_24, %c0_25] : memref<1x128xf32, #tpu.memory_space<vmem>>, vector<1x128xf32>
    %40 = vector.broadcast %39 : vector<1x128xf32> to vector<16x128xf32>
    %41 = arith.addf %38, %40 : vector<16x128xf32>
    %c0_26 = arith.constant 0 : index
    %c0_27 = arith.constant 0 : index
    %42 = vector.load %arg10[%c0_26, %c0_27] : memref<16x128xf32, #tpu.memory_space<vmem>>, vector<16x128xf32>
    tpu.vector_store %arg10[%c0_26, %c0_27], %41 {strides = array<i32>} : memref<16x128xf32, #tpu.memory_space<vmem>>, vector<16x128xf32>,
    return
  }
  func.func @transform_0(%arg0: i32) -> (i32, i32) {
    %c0_i32 = arith.constant 0 : i32
    %c0_i32_0 = arith.constant 0 : i32
    return %arg0, %c0_i32 : i32, i32
  }
  func.func @transform_1(%arg0: i32) -> (i32, i32) {
    %c0_i32 = arith.constant 0 : i32
    %c0_i32_0 = arith.constant 0 : i32
    %c0_i32_1 = arith.constant 0 : i32
    return %c0_i32, %c0_i32_0 : i32, i32
  }
  func.func @transform_2(%arg0: i32) -> (i32, i32) {
    %c0_i32 = arith.constant 0 : i32
    %c0_i32_0 = arith.constant 0 : i32
    %c0_i32_1 = arith.constant 0 : i32
    return %c0_i32, %c0_i32_0 : i32, i32
  }
  func.func @transform_3(%arg0: i32) -> (i32, i32) {
    %c0_i32 = arith.constant 0 : i32
    %c0_i32_0 = arith.constant 0 : i32
    %c0_i32_1 = arith.constant 0 : i32
    return %c0_i32, %c0_i32_0 : i32, i32
  }
  func.func @transform_4(%arg0: i32) -> (i32, i32) {
    %c0_i32 = arith.constant 0 : i32
    %c0_i32_0 = arith.constant 0 : i32
    %c0_i32_1 = arith.constant 0 : i32
    return %c0_i32, %c0_i32_0 : i32, i32
  }
  func.func @transform_5(%arg0: i32) -> (i32, i32) {
    %c0_i32 = arith.constant 0 : i32
    %c0_i32_0 = arith.constant 0 : i32
    %c0_i32_1 = arith.constant 0 : i32
    return %c0_i32, %c0_i32_0 : i32, i32
  }
  func.func @transform_6(%arg0: i32) -> (i32, i32) {
    %c0_i32 = arith.constant 0 : i32
    %c0_i32_0 = arith.constant 0 : i32
    %c0_i32_1 = arith.constant 0 : i32
    return %c0_i32, %c0_i32_0 : i32, i32
  }
  func.func @transform_7(%arg0: i32) -> (i32, i32) {
    %c0_i32 = arith.constant 0 : i32
    %c0_i32_0 = arith.constant 0 : i32
    %c0_i32_1 = arith.constant 0 : i32
    return %c0_i32, %c0_i32_0 : i32, i32
  }
  func.func @transform_8(%arg0: i32) -> (i32, i32) {
    %c0_i32 = arith.constant 0 : i32
    %c0_i32_0 = arith.constant 0 : i32
    %c0_i32_1 = arith.constant 0 : i32
    return %c0_i32, %c0_i32_0 : i32, i32
  }
  func.func @transform_9(%arg0: i32) -> (i32, i32) {
    %c0_i32 = arith.constant 0 : i32
    %c0_i32_0 = arith.constant 0 : i32
    return %arg0, %c0_i32 : i32, i32
  }
}

</mosaic_0001>

<bundles_post_ra>
// kernel: tpu_custom_call.1
= control target key start
LH: loop header
LB: loop body
LE: loop exit
PB: predicated region body
PF: predicated region fallthrough
CT: control target
= control target key end

     0   :  { %14 = vsyncpa [#allocation3], 0  ;;  %s775_s0 = inlined_call_operand.hbm [shape: f32[16,32], index: 0, kind: input, shape index: {}]   ;;  %s776_s1 = inlined_call_operand.hbm [shape: f32[32,64], index: 1, kind: input, shape index: {}]   ;;  %s777_s2 = inlined_call_operand.vmem [shape: f32[1,64], index: 2, kind: input, shape index: {}]   ;;  %s778_s3 = inlined_call_operand.hbm [shape: f32[64,128], index: 3, kind: input, shape index: {}]   ;;  %s779_s4 = inlined_call_operand.vmem [shape: f32[1,128], index: 4, kind: input, shape index: {}]   ;;  %s780_s5 = inlined_call_operand.hbm [shape: f32[128,128], index: 5, kind: input, shape index: {}]   ;;  %s781_s6 = inlined_call_operand.vmem [shape: f32[1,128], index: 6, kind: input, shape index: {}]   ;;  %s782_s7 = inlined_call_operand.vmem [shape: f32[1,128], index: 7, kind: input, shape index: {}]   ;;  %s783_s8 = inlined_call_operand.vmem [shape: f32[1,128], index: 8, kind: input, shape index: {}]   ;;  %s784_s9 = inlined_call_operand.hbm [shape: f32[16,128], index: 9, kind: output, shape index: {}]  }
   0x1   :  { %15 = vsyncpa [#allocation6], 0 }
   0x2   :  { %16 = vsyncpa [#allocation9], 0 }
   0x3   :  { %17 = vsyncpa [#allocation4], 0  ;;  %s671_s30 = smov [#allocation5]   ;;  %s672_s11 = smov [#allocation2]  }
   0x4   :  { %s35_s10 = sshll.u32 %s671_s30, 4  ;;  %s23_s12 = sshll.u32 %s672_s11, 4  ;;  %s36_s10 = int_to_ptr.vmem [resolvable:$true] %s35_s10  ;;  %s24_s12 = int_to_ptr.vmem [resolvable:$true] %s23_s12 }
   0x5   :  { %s571_s13 = scalar_lea.vmem %s36_s10, 512  ;;  %p576_p1 = scmp.lt.s32.totalorder %s36_s10, %s36_s10 }
   0x6   :  { %p572_p0 = scmp.ne.s32.totalorder %s36_s10, %s571_s13  ;;  %p577_p2 = scmp.lt.s32.totalorder %s571_s13, %s571_s13 }
   0x8   :  { %p578_p3 = por %p577_p2, %p576_p1 }
   0xa   :  { %p579_p4 = pnand %p578_p3, %p572_p0 }
   0xc   :  { %582 = shalt.err (!%p579_p4)
}
   0xd   :  { %s673_s14 = smov 128   ;;  %s674_s15 = smov 8  }
   0xe   :  { %41 = dma.hbm_to_vmem [thread:$0]  %s776_s1, 512, %s36_s10, [#allocation6], %s673_s14, %s673_s14, %s674_s15  }
   0xf   :  { %s591_s18 = scalar_lea.vmem %s24_s12, 256  ;;  %p596_p6 = scmp.lt.s32.totalorder %s24_s12, %s24_s12 }
  0x10   :  { %p592_p5 = scmp.ne.s32.totalorder %s24_s12, %s591_s18  ;;  %p597_p7 = scmp.lt.s32.totalorder %s591_s18, %s591_s18 }
  0x12   :  { %p598_p8 = por %p597_p7, %p596_p6 }
  0x14   :  { %p599_p9 = pnand %p598_p8, %p592_p5 }
  0x16   :  { %602 = shalt.err (!%p599_p9)
}
  0x17   :  { %29 = dma.hbm_to_vmem [thread:$0]  %s775_s0, 256, %s24_s12, [#allocation3], %s673_s14, %s673_s14, %s674_s15  }
  0x18   :  { %s675_s21 = smov [#allocation7]   ;;  %s676_s23 = smov [#allocation8]  }
  0x19   :  { %s49_s22 = sshll.u32 %s675_s21, 4  ;;  %s63_s24 = sshll.u32 %s676_s23, 4  ;;  %s50_s22 = int_to_ptr.vmem [resolvable:$true] %s49_s22  ;;  %s64_s24 = int_to_ptr.vmem [resolvable:$true] %s63_s24 }
  0x1a   :  { %s611_s1 = scalar_lea.vmem %s50_s22, 1024  ;;  %p616_p11 = scmp.lt.s32.totalorder %s50_s22, %s50_s22 }
  0x1b   :  { %p612_p10 = scmp.ne.s32.totalorder %s50_s22, %s611_s1  ;;  %p617_p12 = scmp.lt.s32.totalorder %s611_s1, %s611_s1 }
  0x1d   :  { %p618_p13 = por %p617_p12, %p616_p11 }
  0x1f   :  { %p619_p0 = pnand %p618_p13, %p612_p10 }
  0x21   :  { %622 = shalt.err (!%p619_p0)
}
  0x22   :  { %55 = dma.hbm_to_vmem [thread:$0]  %s778_s3, 1024, %s50_s22, [#allocation6], %s673_s14, %s673_s14, %s674_s15  }
  0x23   :  { %s631_s0 = scalar_lea.vmem %s64_s24, 2048  ;;  %p636_p2 = scmp.lt.s32.totalorder %s64_s24, %s64_s24 }
  0x24   :  { %p632_p1 = scmp.ne.s32.totalorder %s64_s24, %s631_s0  ;;  %p637_p3 = scmp.lt.s32.totalorder %s631_s0, %s631_s0 }
  0x26   :  { %p638_p4 = por %p637_p3, %p636_p2 }
  0x28   :  { %p639_p5 = pnand %p638_p4, %p632_p1 }
  0x2a   :  { %642 = shalt.err (!%p639_p5)
}
  0x2b   :  { %69 = dma.hbm_to_vmem [thread:$0]  %s780_s5, 2048, %s64_s24, [#allocation9], %s673_s14, %s673_s14, %s674_s15  }
  0x2c   :  { %663 = dma.done.wait [#allocation3], 256  }
  0x2d   :  { %664 = vsyncadd [#allocation3], 4294967040 }
  0x2e   :  { %665 = dma.done.wait [#allocation6], 1536  }
  0x2f   :  { %666 = vsyncadd [#allocation6], 4294965760 }
  0x30   :  { %667 = dma.done.wait [#allocation9], 2048  }
  0x31   :  { %668 = vsyncadd [#allocation9], 4294965248  ;;  %vm101_vm0 = vcmask 261120   ;;  %v93_v0 = vld [vmem:[#allocation5 + $0x18] sm:$0xff]  ;;  %v92_v1 = vld [vmem:[#allocation5 + $0x10] sm:$0xff]  ;;  %vm200_vm1 = vcmask 523264  }
  0x32   :  { %487 = vmatprep.subr.mxu1 %v93_v0  ;;  %v88_v2 = vld [vmem:[#allocation2] sm:$0xff]  ;;  %v91_v3 = vld [vmem:[#allocation5 + $0x8] sm:$0xff]  ;;  %v90_v4 = vld [vmem:[#allocation5] sm:$0xff]  ;;  %s677_s13 = smov [#allocation10]  }
  0x33   :  { %488 = vmatpush3.msra.mxu1 %v93_v0  ;;  %495 = vmatprep.mubr.msk.f32.mxu1 %vm101_vm0, %v88_v2  ;;  %v89_v5 = vld [vmem:[#allocation2 + $0x8] sm:$0xff]  ;;  %v191_v7 = vld [vmem:[#allocation7 + $0x30] sm:$0xff]  ;;  %v190_v8 = vld [vmem:[#allocation7 + $0x28] sm:$0xff]  ;;  %s430_s16 = sshll.u32 %s677_s13, 4  ;;  %s431_s16 = int_to_ptr.vmem [resolvable:$true] %s430_s16 }
  0x34   :  { %489 = vmatprep.subr.mxu1 %v92_v1  ;;  %v192_v6 = vld [vmem:[#allocation7 + $0x38] sm:$0xff]  ;;  %v189_v9 = vld [vmem:[#allocation7 + $0x20] sm:$0xff]  ;;  %v187_v11 = vld [vmem:[#allocation7 + $0x10] sm:$0xff]  ;;  %s643_s17 = scalar_lea.vmem %s431_s16, 256  ;;  %p648_p7 = scmp.lt.s32.totalorder %s431_s16, %s431_s16 }
  0x35   :  { %490 = vmatpush3.msra.mxu1 %v92_v1  ;;  %v188_v10 = vld [vmem:[#allocation7 + $0x18] sm:$0xff]  ;;  %v186_v12 = vld [vmem:[#allocation7 + $0x8] sm:$0xff]  ;;  %v185_v13 = vld [vmem:[#allocation7] sm:$0xff]  ;;  %p644_p6 = scmp.ne.s32.totalorder %s431_s16, %s643_s17  ;;  %p649_p8 = scmp.lt.s32.totalorder %s643_s17, %s643_s17 }
  0x36   :  { %491 = vmatprep.subr.mxu1 %v91_v3  ;;  %v299_v14 = vld [vmem:[#allocation8 + $0x78] sm:$0xff]  ;;  %v298_v15 = vld [vmem:[#allocation8 + $0x70] sm:$0xff]  ;;  %v297_v16 = vld [vmem:[#allocation8 + $0x68] sm:$0xff] }
  0x37   :  { %492 = vmatpush3.msra.mxu1 %v91_v3  ;;  %517 = vmatprep.subr.mxu0 %v299_v14  ;;  %v296_v17 = vld [vmem:[#allocation8 + $0x60] sm:$0xff]  ;;  %v295_v18 = vld [vmem:[#allocation8 + $0x58] sm:$0xff]  ;;  %v294_v19 = vld [vmem:[#allocation8 + $0x50] sm:$0xff]  ;;  %p650_p9 = por %p649_p8, %p648_p7 }
  0x38   :  { %493 = vmatprep.subr.mxu1 %v90_v4  ;;  %518 = vmatpush3.msra.mxu0 %v299_v14  ;;  %v293_v20 = vld [vmem:[#allocation8 + $0x48] sm:$0xff]  ;;  %v292_v21 = vld [vmem:[#allocation8 + $0x40] sm:$0xff]  ;;  %v291_v22 = vld [vmem:[#allocation8 + $0x38] sm:$0xff] }
  0x39   :  { %494 = vmatpush3.msra.mxu1 %v90_v4  ;;  %519 = vmatprep.subr.mxu0 %v298_v15  ;;  %v290_v23 = vld [vmem:[#allocation8 + $0x30] sm:$0xff]  ;;  %v289_v24 = vld [vmem:[#allocation8 + $0x28] sm:$0xff]  ;;  %v288_v25 = vld [vmem:[#allocation8 + $0x20] sm:$0xff]  ;;  %p651_p10 = pnand %p650_p9, %p644_p6 }
  0x3a   :  { %496 = vmatmul.mubr.msk.f32.vlgmr.msra.gmra.mxu1 %vm101_vm0, %v89_v5  ;;  %498 = vmatprep.subr.mxu1 %v192_v6  ;;  %v444_v26 = vld [vmem:[%s777_s2] ss:$0 sm:$0xff]  ;;  %v287_v33 = vld [vmem:[#allocation8 + $0x18] sm:$0xff]  ;;  %v285_v35 = vld [vmem:[#allocation8 + $0x8] sm:$0xff] }
  0x3b   :  { %499 = vmatpush3.msra.mxu1 %v192_v6  ;;  %520 = vmatpush3.msra.mxu0 %v298_v15  ;;  %v286_v34 = vld [vmem:[#allocation8 + $0x10] sm:$0xff]  ;;  %v284_v36 = vld [vmem:[#allocation8] sm:$0xff] }
  0x3c   :  { %500 = vmatprep.subr.mxu1 %v191_v7  ;;  %521 = vmatprep.subr.mxu0 %v297_v16  ;;  %v447_v37 = vld [vmem:[%s779_s4] ss:$0 sm:$0xff] }
  0x3d   :  { %501 = vmatpush3.msra.mxu1 %v191_v7  ;;  %522 = vmatpush3.msra.mxu0 %v297_v16  ;;  %v450_v45 = vld [vmem:[%s781_s6] ss:$0 sm:$0xff] }
  0x3e   :  { %502 = vmatprep.subr.mxu1 %v190_v8  ;;  %523 = vmatprep.subr.mxu0 %v296_v17  ;;  %v451_v0 = vld [vmem:[%s782_s7] ss:$0 sm:$0xff] }
  0x3f   :  { %503 = vmatpush3.msra.mxu1 %v190_v8  ;;  %524 = vmatpush3.msra.mxu0 %v296_v17  ;;  %v452_v2 = vld [vmem:[%s783_s8] ss:$0 sm:$0xff] }
  0x40   :  { %504 = vmatprep.subr.mxu1 %v189_v9  ;;  %525 = vmatprep.subr.mxu0 %v295_v18 }
  0x41   :  { %505 = vmatpush3.msra.mxu1 %v189_v9  ;;  %526 = vmatpush3.msra.mxu0 %v295_v18 }
  0x42   :  { %506 = vmatprep.subr.mxu1 %v188_v10  ;;  %527 = vmatprep.subr.mxu0 %v294_v19 }
  0x43   :  { %507 = vmatpush3.msra.mxu1 %v188_v10  ;;  %528 = vmatpush3.msra.mxu0 %v294_v19 }
  0x44   :  { %508 = vmatprep.subr.mxu1 %v187_v11  ;;  %529 = vmatprep.subr.mxu0 %v293_v20 }
  0x45   :  { %509 = vmatpush3.msra.mxu1 %v187_v11  ;;  %530 = vmatpush3.msra.mxu0 %v293_v20 }
  0x46   :  { %510 = vmatprep.subr.mxu1 %v186_v12  ;;  %531 = vmatprep.subr.mxu0 %v292_v21 }
  0x47   :  { %511 = vmatpush3.msra.mxu1 %v186_v12  ;;  %532 = vmatpush3.msra.mxu0 %v292_v21 }
  0x48   :  { %512 = vmatprep.subr.mxu1 %v185_v13  ;;  %533 = vmatprep.subr.mxu0 %v291_v22 }
  0x49   :  { %513 = vmatpush3.msra.mxu1 %v185_v13  ;;  %534 = vmatpush3.msra.mxu0 %v291_v22 }
  0x4a   :  { %535 = vmatprep.subr.mxu0 %v290_v23 }
  0x4b   :  { %536 = vmatpush3.msra.mxu0 %v290_v23 }
  0x4c   :  { %537 = vmatprep.subr.mxu0 %v289_v24 }
  0x4d   :  { %538 = vmatpush3.msra.mxu0 %v289_v24 }
  0x4e   :  { %539 = vmatprep.subr.mxu0 %v288_v25 }
  0x4f   :  { %540 = vmatpush3.msra.mxu0 %v288_v25 }
  0x50   :  { %541 = vmatprep.subr.mxu0 %v287_v33 }
  0x51   :  { %542 = vmatpush3.msra.mxu0 %v287_v33 }
  0x52   :  { %543 = vmatprep.subr.mxu0 %v286_v34 }
  0x53   :  { %544 = vmatpush3.msra.mxu0 %v286_v34 }
  0x54   :  { %545 = vmatprep.subr.mxu0 %v285_v35 }
  0x55   :  { %546 = vmatpush3.msra.mxu0 %v285_v35 }
  0x56   :  { %547 = vmatprep.subr.mxu0 %v284_v36 }
  0x57   :  { %548 = vmatpush3.msra.mxu0 %v284_v36 }
  0xfa   :  { %v497_v27 = vpop.f32.mrf.mxu1 }
  0xfb   :  { %v180_v28 = vadd.f32 %v497_v27, %v444_v26 }
  0xfc   :  { %v174_v29 = vpop.f32.mrf.mxu1 }
  0xfd   :  { %v175_v30 = vadd.f32 %v444_v26, %v174_v29  ;;  %v184_v32 = vmax.f32 %v180_v28, 0.0 }
  0xff   :  { %v183_v31 = vmax.f32 %v175_v30, 0.0 }
 0x101   :  { %514 = vmatprep.mubr.msk.f32.mxu1 %vm200_vm1, %v183_v31 }
 0x102   :  { %515 = vmatmul.mubr.msk.f32.vlgmr.msra.gmra.mxu1 %vm200_vm1, %v184_v32 }
 0x1c2   :  { %v516_v38 = vpop.f32.mrf.mxu1 }
 0x1c3   :  { %v279_v39 = vadd.f32 %v516_v38, %v447_v37 }
 0x1c4   :  { %v273_v40 = vpop.f32.mrf.mxu1 }
 0x1c5   :  { %v274_v41 = vadd.f32 %v447_v37, %v273_v40  ;;  %v283_v43 = vmax.f32 %v279_v39, 0.0 }
 0x1c7   :  { %v282_v42 = vmax.f32 %v274_v41, 0.0 }
 0x1c9   :  { %549 = vmatprep.mubr.f32.mxu0 %v282_v42 }
 0x1ca   :  { %550 = vmatmul.mubr.f32.vlgmr.msra.gmra.mxu0 %v283_v43 }
 0x28a   :  { %v551_v44 = vpop.f32.mrf.mxu0 }
 0x28b   :  { %v379_v48 = vadd.f32 %v551_v44, %v450_v45 }
 0x28c   :  { %v373_v46 = vpop.f32.mrf.mxu0 }
 0x28d   :  { %v374_v47 = vadd.f32 %v450_v45, %v373_v46 }
 0x28f   :  { %382 = vadd.xlane.f32.xlu0 %v374_v47 }
 0x293   :  { %384 = vadd.xlane.f32.xlu0 %v379_v48 }
 0x318   :  { %v383_v49 = vpop.xlane.xlu0 %382 }
 0x319   :  { %v387_v50 = vmul.f32 0.0078125, %v383_v49 }
 0x31b   :  { %v389_v51 = vsub.f32 %v374_v47, %v387_v50 }
 0x31c   :  { %v385_v52 = vpop.xlane.xlu0 %384 }
 0x31d   :  { %v388_v53 = vmul.f32 0.0078125, %v385_v52  ;;  %v391_v54 = vmul.f32 %v389_v51, %v389_v51 }
 0x31f   :  { %v390_v55 = vsub.f32 %v379_v48, %v388_v53  ;;  %393 = vadd.xlane.f32.xlu1 %v391_v54 }
 0x321   :  { %v392_v56 = vmul.f32 %v390_v55, %v390_v55 }
 0x323   :  { %395 = vadd.xlane.f32.xlu1 %v392_v56 }
 0x3a8   :  { %v394_v57 = vpop.xlane.xlu1 %393 }
 0x3a9   :  { %v397_v58 = vmul.f32 0.0078125, %v394_v57 }
 0x3ab   :  { %v399_v59 = vadd.f32 1e-05, %v397_v58 }
 0x3ac   :  { %v396_v60 = vpop.xlane.xlu1 %395 }
 0x3ad   :  { %559 = vrsqrt.f32 %v399_v59  ;;  %v398_v61 = vmul.f32 0.0078125, %v396_v60 }
 0x3af   :  { %v400_v62 = vadd.f32 1e-05, %v398_v61 }
 0x3b1   :  { %561 = vrsqrt.f32 %v400_v62 }
 0x3ba   :  { %v560_v63 = vpop.eup %559 }
 0x3bb   :  { %v403_v1 = vmul.f32 %v560_v63, %v389_v51 }
 0x3bd   :  { %v412_v3 = vmul.f32 %v451_v0, %v403_v1 }
 0x3be   :  { %v562_v4 = vpop.eup %561 }
 0x3bf   :  { %v404_v5 = vmul.f32 %v562_v4, %v390_v55  ;;  %v421_v6 = vadd.f32 %v452_v2, %v412_v3 }
 0x3c1   :  { %v413_v7 = vmul.f32 %v451_v0, %v404_v5  ;;  %423 = vst [vmem:[#allocation10] sm:$0xff] %v421_v6 }
 0x3c3   :  { %v422_v8 = vadd.f32 %v452_v2, %v413_v7 }
 0x3c5   :  { %424 = vst [vmem:[#allocation10 + $0x8] sm:$0xff] %v422_v8 }
 0x3c6   :  { %654 = shalt.err (!%p651_p10)
}
 0x3c7   :  { %436 = dma.vmem_to_hbm [thread:$0]  %s431_s16, 256, %s784_s9, [#allocation4], %s673_s14, %s673_s14, %s674_s15  }
 0x3c8   :  { %669 = dma.done.wait [#allocation4], 256  }
 0x3c9   :  { %670 = vsyncadd [#allocation4], 4294967040 }
 0x3ca   :  { %440 = vsyncpa [#allocation3], 1 }
 0x3cb   :  { %441 = vsyncpa [#allocation6], 1 }
 0x3cc   :  { %442 = vsyncpa [#allocation9], 1 }
 0x3cd   :  { %443 = vsyncpa [#allocation4], 1 }

// kernel: tpu_custom_call.1
= control target key start
LH: loop header
LB: loop body
LE: loop exit
PB: predicated region body
PF: predicated region fallthrough
CT: control target
= control target key end

     0   :  { %14 = vsyncpa [#allocation3], 0  ;;  %s775_s0 = inlined_call_operand.hbm [shape: f32[16,32], index: 0, kind: input, shape index: {}]   ;;  %s776_s1 = inlined_call_operand.hbm [shape: f32[32,64], index: 1, kind: input, shape index: {}]   ;;  %s777_s2 = inlined_call_operand.vmem [shape: f32[1,64], index: 2, kind: input, shape index: {}]   ;;  %s778_s3 = inlined_call_operand.hbm [shape: f32[64,128], index: 3, kind: input, shape index: {}]   ;;  %s779_s4 = inlined_call_operand.vmem [shape: f32[1,128], index: 4, kind: input, shape index: {}]   ;;  %s780_s5 = inlined_call_operand.hbm [shape: f32[128,128], index: 5, kind: input, shape index: {}]   ;;  %s781_s6 = inlined_call_operand.vmem [shape: f32[1,128], index: 6, kind: input, shape index: {}]   ;;  %s782_s7 = inlined_call_operand.vmem [shape: f32[1,128], index: 7, kind: input, shape index: {}]   ;;  %s783_s8 = inlined_call_operand.vmem [shape: f32[1,128], index: 8, kind: input, shape index: {}]   ;;  %s784_s9 = inlined_call_operand.hbm [shape: f32[16,128], index: 9, kind: output, shape index: {}]  }
   0x1   :  { %15 = vsyncpa [#allocation6], 0 }
   0x2   :  { %16 = vsyncpa [#allocation9], 0 }
   0x3   :  { %17 = vsyncpa [#allocation4], 0  ;;  %s671_s30 = smov [#allocation5]   ;;  %s672_s11 = smov [#allocation2]  }
   0x4   :  { %s35_s10 = sshll.u32 %s671_s30, 4  ;;  %s23_s12 = sshll.u32 %s672_s11, 4  ;;  %s36_s10 = int_to_ptr.vmem [resolvable:$true] %s35_s10  ;;  %s24_s12 = int_to_ptr.vmem [resolvable:$true] %s23_s12 }
   0x5   :  { %s571_s13 = scalar_lea.vmem %s36_s10, 512  ;;  %p576_p1 = scmp.lt.s32.totalorder %s36_s10, %s36_s10 }
   0x6   :  { %p572_p0 = scmp.ne.s32.totalorder %s36_s10, %s571_s13  ;;  %p577_p2 = scmp.lt.s32.totalorder %s571_s13, %s571_s13 }
   0x8   :  { %p578_p3 = por %p577_p2, %p576_p1 }
   0xa   :  { %p579_p4 = pnand %p578_p3, %p572_p0 }
   0xc   :  { %582 = shalt.err (!%p579_p4)
}
   0xd   :  { %s673_s14 = smov 128   ;;  %s674_s15 = smov 8  }
   0xe   :  { %41 = dma.hbm_to_vmem [thread:$0]  %s776_s1, 512, %s36_s10, [#allocation6], %s673_s14, %s673_s14, %s674_s15  }
   0xf   :  { %s591_s18 = scalar_lea.vmem %s24_s12, 256  ;;  %p596_p6 = scmp.lt.s32.totalorder %s24_s12, %s24_s12 }
  0x10   :  { %p592_p5 = scmp.ne.s32.totalorder %s24_s12, %s591_s18  ;;  %p597_p7 = scmp.lt.s32.totalorder %s591_s18, %s591_s18 }
  0x12   :  { %p598_p8 = por %p597_p7, %p596_p6 }
  0x14   :  { %p599_p9 = pnand %p598_p8, %p592_p5 }
  0x16   :  { %602 = shalt.err (!%p599_p9)
}
  0x17   :  { %29 = dma.hbm_to_vmem [thread:$0]  %s775_s0, 256, %s24_s12, [#allocation3], %s673_s14, %s673_s14, %s674_s15  }
  0x18   :  { %s675_s21 = smov [#allocation7]   ;;  %s676_s23 = smov [#allocation8]  }
  0x19   :  { %s49_s22 = sshll.u32 %s675_s21, 4  ;;  %s63_s24 = sshll.u32 %s676_s23, 4  ;;  %s50_s22 = int_to_ptr.vmem [resolvable:$true] %s49_s22  ;;  %s64_s24 = int_to_ptr.vmem [resolvable:$true] %s63_s24 }
  0x1a   :  { %s611_s1 = scalar_lea.vmem %s50_s22, 1024  ;;  %p616_p11 = scmp.lt.s32.totalorder %s50_s22, %s50_s22 }
  0x1b   :  { %p612_p10 = scmp.ne.s32.totalorder %s50_s22, %s611_s1  ;;  %p617_p12 = scmp.lt.s32.totalorder %s611_s1, %s611_s1 }
  0x1d   :  { %p618_p13 = por %p617_p12, %p616_p11 }
  0x1f   :  { %p619_p0 = pnand %p618_p13, %p612_p10 }
  0x21   :  { %622 = shalt.err (!%p619_p0)
}
  0x22   :  { %55 = dma.hbm_to_vmem [thread:$0]  %s778_s3, 1024, %s50_s22, [#allocation6], %s673_s14, %s673_s14, %s674_s15  }
  0x23   :  { %s631_s0 = scalar_lea.vmem %s64_s24, 2048  ;;  %p636_p2 = scmp.lt.s32.totalorder %s64_s24, %s64_s24 }
  0x24   :  { %p632_p1 = scmp.ne.s32.totalorder %s64_s24, %s631_s0  ;;  %p637_p3 = scmp.lt.s32.totalorder %s631_s0, %s631_s0 }
  0x26   :  { %p638_p4 = por %p637_p3, %p636_p2 }
  0x28   :  { %p639_p5 = pnand %p638_p4, %p632_p1 }
  0x2a   :  { %642 = shalt.err (!%p639_p5)
}
  0x2b   :  { %69 = dma.hbm_to_vmem [thread:$0]  %s780_s5, 2048, %s64_s24, [#allocation9], %s673_s14, %s673_s14, %s674_s15  }
  0x2c   :  { %663 = dma.done.wait [#allocation3], 256  }
  0x2d   :  { %664 = vsyncadd [#allocation3], 4294967040 }
  0x2e   :  { %665 = dma.done.wait [#allocation6], 1536  }
  0x2f   :  { %666 = vsyncadd [#allocation6], 4294965760 }
  0x30   :  { %667 = dma.done.wait [#allocation9], 2048  }
  0x31   :  { %668 = vsyncadd [#allocation9], 4294965248  ;;  %vm101_vm0 = vcmask 261120   ;;  %v93_v0 = vld [vmem:[#allocation5 + $0x18] sm:$0xff]  ;;  %v92_v1 = vld [vmem:[#allocation5 + $0x10] sm:$0xff]  ;;  %vm200_vm1 = vcmask 523264  }
  0x32   :  { %487 = vmatprep.subr.mxu1 %v93_v0  ;;  %v88_v2 = vld [vmem:[#allocation2] sm:$0xff]  ;;  %v91_v3 = vld [vmem:[#allocation5 + $0x8] sm:$0xff]  ;;  %v90_v4 = vld [vmem:[#allocation5] sm:$0xff]  ;;  %s677_s13 = smov [#allocation10]  }
  0x33   :  { %488 = vmatpush3.msra.mxu1 %v93_v0  ;;  %495 = vmatprep.mubr.msk.f32.mxu1 %vm101_vm0, %v88_v2  ;;  %v89_v5 = vld [vmem:[#allocation2 + $0x8] sm:$0xff]  ;;  %v191_v7 = vld [vmem:[#allocation7 + $0x30] sm:$0xff]  ;;  %v190_v8 = vld [vmem:[#allocation7 + $0x28] sm:$0xff]  ;;  %s430_s16 = sshll.u32 %s677_s13, 4  ;;  %s431_s16 = int_to_ptr.vmem [resolvable:$true] %s430_s16 }
  0x34   :  { %489 = vmatprep.subr.mxu1 %v92_v1  ;;  %v192_v6 = vld [vmem:[#allocation7 + $0x38] sm:$0xff]  ;;  %v189_v9 = vld [vmem:[#allocation7 + $0x20] sm:$0xff]  ;;  %v187_v11 = vld [vmem:[#allocation7 + $0x10] sm:$0xff]  ;;  %s643_s17 = scalar_lea.vmem %s431_s16, 256  ;;  %p648_p7 = scmp.lt.s32.totalorder %s431_s16, %s431_s16 }
  0x35   :  { %490 = vmatpush3.msra.mxu1 %v92_v1  ;;  %v188_v10 = vld [vmem:[#allocation7 + $0x18] sm:$0xff]  ;;  %v186_v12 = vld [vmem:[#allocation7 + $0x8] sm:$0xff]  ;;  %v185_v13 = vld [vmem:[#allocation7] sm:$0xff]  ;;  %p644_p6 = scmp.ne.s32.totalorder %s431_s16, %s643_s17  ;;  %p649_p8 = scmp.lt.s32.totalorder %s643_s17, %s643_s17 }
  0x36   :  { %491 = vmatprep.subr.mxu1 %v91_v3  ;;  %v299_v14 = vld [vmem:[#allocation8 + $0x78] sm:$0xff]  ;;  %v298_v15 = vld [vmem:[#allocation8 + $0x70] sm:$0xff]  ;;  %v297_v16 = vld [vmem:[#allocation8 + $0x68] sm:$0xff] }
  0x37   :  { %492 = vmatpush3.msra.mxu1 %v91_v3  ;;  %517 = vmatprep.subr.mxu0 %v299_v14  ;;  %v296_v17 = vld [vmem:[#allocation8 + $0x60] sm:$0xff]  ;;  %v295_v18 = vld [vmem:[#allocation8 + $0x58] sm:$0xff]  ;;  %v294_v19 = vld [vmem:[#allocation8 + $0x50] sm:$0xff]  ;;  %p650_p9 = por %p649_p8, %p648_p7 }
  0x38   :  { %493 = vmatprep.subr.mxu1 %v90_v4  ;;  %518 = vmatpush3.msra.mxu0 %v299_v14  ;;  %v293_v20 = vld [vmem:[#allocation8 + $0x48] sm:$0xff]  ;;  %v292_v21 = vld [vmem:[#allocation8 + $0x40] sm:$0xff]  ;;  %v291_v22 = vld [vmem:[#allocation8 + $0x38] sm:$0xff] }
  0x39   :  { %494 = vmatpush3.msra.mxu1 %v90_v4  ;;  %519 = vmatprep.subr.mxu0 %v298_v15  ;;  %v290_v23 = vld [vmem:[#allocation8 + $0x30] sm:$0xff]  ;;  %v289_v24 = vld [vmem:[#allocation8 + $0x28] sm:$0xff]  ;;  %v288_v25 = vld [vmem:[#allocation8 + $0x20] sm:$0xff]  ;;  %p651_p10 = pnand %p650_p9, %p644_p6 }
  0x3a   :  { %496 = vmatmul.mubr.msk.f32.vlgmr.msra.gmra.mxu1 %vm101_vm0, %v89_v5  ;;  %498 = vmatprep.subr.mxu1 %v192_v6  ;;  %v444_v26 = vld [vmem:[%s777_s2] ss:$0 sm:$0xff]  ;;  %v287_v33 = vld [vmem:[#allocation8 + $0x18] sm:$0xff]  ;;  %v285_v35 = vld [vmem:[#allocation8 + $0x8] sm:$0xff] }
  0x3b   :  { %499 = vmatpush3.msra.mxu1 %v192_v6  ;;  %520 = vmatpush3.msra.mxu0 %v298_v15  ;;  %v286_v34 = vld [vmem:[#allocation8 + $0x10] sm:$0xff]  ;;  %v284_v36 = vld [vmem:[#allocation8] sm:$0xff] }
  0x3c   :  { %500 = vmatprep.subr.mxu1 %v191_v7  ;;  %521 = vmatprep.subr.mxu0 %v297_v16  ;;  %v447_v37 = vld [vmem:[%s779_s4] ss:$0 sm:$0xff] }
  0x3d   :  { %501 = vmatpush3.msra.mxu1 %v191_v7  ;;  %522 = vmatpush3.msra.mxu0 %v297_v16  ;;  %v450_v45 = vld [vmem:[%s781_s6] ss:$0 sm:$0xff] }
  0x3e   :  { %502 = vmatprep.subr.mxu1 %v190_v8  ;;  %523 = vmatprep.subr.mxu0 %v296_v17  ;;  %v451_v0 = vld [vmem:[%s782_s7] ss:$0 sm:$0xff] }
  0x3f   :  { %503 = vmatpush3.msra.mxu1 %v190_v8  ;;  %524 = vmatpush3.msra.mxu0 %v296_v17  ;;  %v452_v2 = vld [vmem:[%s783_s8] ss:$0 sm:$0xff] }
  0x40   :  { %504 = vmatprep.subr.mxu1 %v189_v9  ;;  %525 = vmatprep.subr.mxu0 %v295_v18 }
  0x41   :  { %505 = vmatpush3.msra.mxu1 %v189_v9  ;;  %526 = vmatpush3.msra.mxu0 %v295_v18 }
  0x42   :  { %506 = vmatprep.subr.mxu1 %v188_v10  ;;  %527 = vmatprep.subr.mxu0 %v294_v19 }
  0x43   :  { %507 = vmatpush3.msra.mxu1 %v188_v10  ;;  %528 = vmatpush3.msra.mxu0 %v294_v19 }
  0x44   :  { %508 = vmatprep.subr.mxu1 %v187_v11  ;;  %529 = vmatprep.subr.mxu0 %v293_v20 }
  0x45   :  { %509 = vmatpush3.msra.mxu1 %v187_v11  ;;  %530 = vmatpush3.msra.mxu0 %v293_v20 }
  0x46   :  { %510 = vmatprep.subr.mxu1 %v186_v12  ;;  %531 = vmatprep.subr.mxu0 %v292_v21 }
  0x47   :  { %511 = vmatpush3.msra.mxu1 %v186_v12  ;;  %532 = vmatpush3.msra.mxu0 %v292_v21 }
  0x48   :  { %512 = vmatprep.subr.mxu1 %v185_v13  ;;  %533 = vmatprep.subr.mxu0 %v291_v22 }
  0x49   :  { %513 = vmatpush3.msra.mxu1 %v185_v13  ;;  %534 = vmatpush3.msra.mxu0 %v291_v22 }
  0x4a   :  { %535 = vmatprep.subr.mxu0 %v290_v23 }
  0x4b   :  { %536 = vmatpush3.msra.mxu0 %v290_v23 }
  0x4c   :  { %537 = vmatprep.subr.mxu0 %v289_v24 }
  0x4d   :  { %538 = vmatpush3.msra.mxu0 %v289_v24 }
  0x4e   :  { %539 = vmatprep.subr.mxu0 %v288_v25 }
  0x4f   :  { %540 = vmatpush3.msra.mxu0 %v288_v25 }
  0x50   :  { %541 = vmatprep.subr.mxu0 %v287_v33 }
  0x51   :  { %542 = vmatpush3.msra.mxu0 %v287_v33 }
  0x52   :  { %543 = vmatprep.subr.mxu0 %v286_v34 }
  0x53   :  { %544 = vmatpush3.msra.mxu0 %v286_v34 }
  0x54   :  { %545 = vmatprep.subr.mxu0 %v285_v35 }
  0x55   :  { %546 = vmatpush3.msra.mxu0 %v285_v35 }
  0x56   :  { %547 = vmatprep.subr.mxu0 %v284_v36 }
  0x57   :  { %548 = vmatpush3.msra.mxu0 %v284_v36 }
  0xfa   :  { %v497_v27 = vpop.f32.mrf.mxu1 }
  0xfb   :  { %v180_v28 = vadd.f32 %v497_v27, %v444_v26 }
  0xfc   :  { %v174_v29 = vpop.f32.mrf.mxu1 }
  0xfd   :  { %v175_v30 = vadd.f32 %v444_v26, %v174_v29  ;;  %v184_v32 = vmax.f32 %v180_v28, 0.0 }
  0xff   :  { %v183_v31 = vmax.f32 %v175_v30, 0.0 }
 0x101   :  { %514 = vmatprep.mubr.msk.f32.mxu1 %vm200_vm1, %v183_v31 }
 0x102   :  { %515 = vmatmul.mubr.msk.f32.vlgmr.msra.gmra.mxu1 %vm200_vm1, %v184_v32 }
 0x1c2   :  { %v516_v38 = vpop.f32.mrf.mxu1 }
 0x1c3   :  { %v279_v39 = vadd.f32 %v516_v38, %v447_v37 }
 0x1c4   :  { %v273_v40 = vpop.f32.mrf.mxu1 }
 0x1c5   :  { %v274_v41 = vadd.f32 %v447_v37, %v273_v40  ;;  %v283_v43 = vmax.f32 %v279_v39, 0.0 }
 0x1c7   :  { %v282_v42 = vmax.f32 %v274_v41, 0.0 }
 0x1c9   :  { %549 = vmatprep.mubr.f32.mxu0 %v282_v42 }
 0x1ca   :  { %550 = vmatmul.mubr.f32.vlgmr.msra.gmra.mxu0 %v283_v43 }
 0x28a   :  { %v551_v44 = vpop.f32.mrf.mxu0 }
 0x28b   :  { %v379_v48 = vadd.f32 %v551_v44, %v450_v45 }
 0x28c   :  { %v373_v46 = vpop.f32.mrf.mxu0 }
 0x28d   :  { %v374_v47 = vadd.f32 %v450_v45, %v373_v46 }
 0x28f   :  { %382 = vadd.xlane.f32.xlu0 %v374_v47 }
 0x293   :  { %384 = vadd.xlane.f32.xlu0 %v379_v48 }
 0x318   :  { %v383_v49 = vpop.xlane.xlu0 %382 }
 0x319   :  { %v387_v50 = vmul.f32 0.0078125, %v383_v49 }
 0x31b   :  { %v389_v51 = vsub.f32 %v374_v47, %v387_v50 }
 0x31c   :  { %v385_v52 = vpop.xlane.xlu0 %384 }
 0x31d   :  { %v388_v53 = vmul.f32 0.0078125, %v385_v52  ;;  %v391_v54 = vmul.f32 %v389_v51, %v389_v51 }
 0x31f   :  { %v390_v55 = vsub.f32 %v379_v48, %v388_v53  ;;  %393 = vadd.xlane.f32.xlu1 %v391_v54 }
 0x321   :  { %v392_v56 = vmul.f32 %v390_v55, %v390_v55 }
 0x323   :  { %395 = vadd.xlane.f32.xlu1 %v392_v56 }
 0x3a8   :  { %v394_v57 = vpop.xlane.xlu1 %393 }
 0x3a9   :  { %v397_v58 = vmul.f32 0.0078125, %v394_v57 }
 0x3ab   :  { %v399_v59 = vadd.f32 1e-05, %v397_v58 }
 0x3ac   :  { %v396_v60 = vpop.xlane.xlu1 %395 }
 0x3ad   :  { %559 = vrsqrt.f32 %v399_v59  ;;  %v398_v61 = vmul.f32 0.0078125, %v396_v60 }
 0x3af   :  { %v400_v62 = vadd.f32 1e-05, %v398_v61 }
 0x3b1   :  { %561 = vrsqrt.f32 %v400_v62 }
 0x3ba   :  { %v560_v63 = vpop.eup %559 }
 0x3bb   :  { %v403_v1 = vmul.f32 %v560_v63, %v389_v51 }
 0x3bd   :  { %v412_v3 = vmul.f32 %v451_v0, %v403_v1 }
 0x3be   :  { %v562_v4 = vpop.eup %561 }
 0x3bf   :  { %v404_v5 = vmul.f32 %v562_v4, %v390_v55  ;;  %v421_v6 = vadd.f32 %v452_v2, %v412_v3 }
 0x3c1   :  { %v413_v7 = vmul.f32 %v451_v0, %v404_v5  ;;  %423 = vst [vmem:[#allocation10] sm:$0xff] %v421_v6 }
 0x3c3   :  { %v422_v8 = vadd.f32 %v452_v2, %v413_v7 }
 0x3c5   :  { %424 = vst [vmem:[#allocation10 + $0x8] sm:$0xff] %v422_v8 }
 0x3c6   :  { %654 = shalt.err (!%p651_p10)
}
 0x3c7   :  { %436 = dma.vmem_to_hbm [thread:$0]  %s431_s16, 256, %s784_s9, [#allocation4], %s673_s14, %s673_s14, %s674_s15  }
 0x3c8   :  { %669 = dma.done.wait [#allocation4], 256  }
 0x3c9   :  { %670 = vsyncadd [#allocation4], 4294967040 }
 0x3ca   :  { %440 = vsyncpa [#allocation3], 1 }
 0x3cb   :  { %441 = vsyncpa [#allocation6], 1 }
 0x3cc   :  { %442 = vsyncpa [#allocation9], 1 }
 0x3cd   :  { %443 = vsyncpa [#allocation4], 1 }

</bundles_post_ra>
